<compile_context>
chip_gen: v5e
topology: v5e:2x2
jax: 0.10.0
libtpu: 0.0.40
codegen_flags: <defaults>
</compile_context>

<pallas_src>
import math

import jax
import jax.numpy as jnp
from jax.experimental import pallas as pl
from jax.experimental.pallas import tpu as pltpu


def _round_up(a: int, b: int) -> int:
    return (a + b - 1) // b * b


# ----------------------------- Pallas kernel --------------------------------
def gmm_nll_kernel(x_ref, w_ref, bias_ref, o_ref):
    # x_ref:    (TN, D)   tile of samples (native dtype)
    # w_ref:    (2D, K)   packed weights: rows [0:D) = (-0.5/cov).T,
    #                                     rows [D:2D) = (mean/cov).T
    # bias_ref: (K, 1)    per-component constants (+ scalar prior folded in)
    # o_ref:    (1, TN)   negative log density per sample (lane-dense row)
    x_in = x_ref[...]
    xf = x_in.astype(jnp.float32)
    mxu_dt = w_ref.dtype  # f32, or bf16 when x is bf16 (native MXU rate)

    # single fused MXU contraction: [x*x, x] @ [[-0.5/cov], [mean/cov]]
    xc = jnp.concatenate(
        [(xf * xf).astype(mxu_dt), x_in.astype(mxu_dt)], axis=1)        # (TN, 2D)
    y = jnp.dot(xc, w_ref[...], preferred_element_type=jnp.float32)     # (TN, K)

    # components -> sublanes: dense vregs for exp/max/sum, lane-dense result.
    yt = y.T + bias_ref[...]                                            # (K, TN)

    # logsumexp over mixture components (sublane reduction).
    m = jnp.max(yt, axis=0, keepdims=True)                              # (1, TN)
    s = jnp.sum(jnp.exp(yt - m), axis=0, keepdims=True)                 # (1, TN)
    o_ref[...] = -(m + jnp.log(s))


def gmm_forward_pallas(x, mean, log_var, weight, prior_scalar, *, tile_n=8192):
    """Negative log probability density of x under the GMM (diagonal cov)."""
    N, D = x.shape
    K = mean.shape[0]
    log_var_factor = 0.5  # 'diagonal' covariance

    # ---- fold all per-component constants (and the scalar prior) into bias
    inv_cov = jnp.exp(-log_var).astype(jnp.float32)             # (K, D)
    w_quad = (-0.5 * inv_cov).T                                 # (D, K)
    w_lin = (mean.astype(jnp.float32) * inv_cov).T              # (D, K)
    w_packed = jnp.concatenate([w_quad, w_lin], axis=0)         # (2D, K)
    # bf16 inputs -> feed the MXU bf16 operands (accumulation stays f32)
    if x.dtype == jnp.bfloat16:
        w_packed = w_packed.astype(jnp.bfloat16)

    pi_term = -0.5 * D * math.log(2.0 * math.pi)
    bias = (-0.5 * jnp.sum(mean * mean * inv_cov, axis=-1)
            - log_var_factor * jnp.sum(log_var, axis=-1)
            + pi_term
            + jax.nn.log_softmax(weight, axis=0)
            + prior_scalar)                     # logsumexp(y + c) = logsumexp(y) + c
    bias = bias.reshape(K, 1).astype(jnp.float32)

    # ---- tiling: big, 128-aligned tiles; no padding (cdiv grid, ragged tail).
    tn = min(int(tile_n), _round_up(N, 128))
    if N > 128:
        # keep >=2 grid steps so both v7x TensorCores get tiles
        tn = min(tn, _round_up(pl.cdiv(N, 2), 128))
    tn = _round_up(max(tn, 128), 128)
    grid = pl.cdiv(N, tn)

    itemsize = jnp.dtype(x.dtype).itemsize
    cost = pl.CostEstimate(
        flops=int(2 * N * (2 * D) * K),
        transcendentals=int(N * (K + 1)),
        bytes_accessed=int(N * D * itemsize + N * 4 + 2 * D * K * 4 + K * 4),
    )

    out = pl.pallas_call(
        gmm_nll_kernel,
        out_shape=jax.ShapeDtypeStruct((1, N), jnp.float32),
        grid_spec=pltpu.PrefetchScalarGridSpec(
            num_scalar_prefetch=0,
            grid=(grid,),
            in_specs=[
                pl.BlockSpec((tn, D), lambda i: (i, 0)),        # x tile
                pl.BlockSpec((2 * D, K), lambda i: (0, 0)),     # packed weights (resident)
                pl.BlockSpec((K, 1), lambda i: (0, 0)),         # bias (+ prior)
            ],
            out_specs=pl.BlockSpec((1, tn), lambda i: (0, i)),  # lane-dense row
        ),
        compiler_params=pltpu.CompilerParams(
            dimension_semantics=("parallel",)),                 # shard tiles over TCs
        cost_estimate=cost,
    )(x, w_packed, bias)
    return out[0]


# ------------------------- parameter init / priors --------------------------
def softball_sample(key, n, dim, radius):
    k1, k2 = jax.random.split(key)
    s = jax.random.normal(k1, (n, dim), dtype=jnp.float32)
    s = s / jnp.linalg.norm(s, axis=-1, keepdims=True)
    local_len = radius * jax.random.uniform(k2, (n, 1), dtype=jnp.float32) ** (1.0 / dim)
    return s * local_len


def prior_log_prob(mean, log_var, dim, n_mix_comp, mean_init, sd_init, weight_alpha=1):
    """Scalar prior term added after the logsumexp (matches _prior_log_prob)."""
    radius, sharpness = mean_init
    p = math.lgamma(n_mix_comp * weight_alpha) - n_mix_comp * math.lgamma(weight_alpha)
    # weight_alpha == 1 -> no extra Dirichlet term
    softball_norm = math.lgamma(1 + dim * 0.5) - dim * (math.log(radius) + 0.5 * math.log(math.pi))
    mean_norm = jnp.linalg.norm(mean, axis=-1)
    p = p + jnp.sum(softball_norm
                    - jnp.log(1.0 + jnp.exp(sharpness * (mean_norm / radius - 1.0))))
    # Gaussian prior on -log_var with mean = -2*log(sd_init[0]), std = sd_init[1]
    mu = -2.0 * math.log(sd_init[0])
    sd = sd_init[1]
    v = -log_var
    p = p + jnp.sum(-0.5 * ((v - mu) / sd) ** 2 - math.log(sd) - 0.5 * math.log(2.0 * math.pi))
    return p


# ------------------------------ pure-JAX ref ---------------------------------
def gmm_forward_ref(x, mean, log_var, weight, prior_scalar):
    dim = x.shape[-1]
    cov = jnp.exp(log_var)
    y = -jnp.sum((x[:, None, :] - mean[None, :, :]) ** 2 / (2.0 * cov[None, :, :]), axis=-1)
    y = y - 0.5 * jnp.sum(log_var, axis=-1)
    y = y + (-0.5 * dim * math.log(2.0 * math.pi))
    y = y + jax.nn.log_softmax(weight, axis=0)
    y = jax.scipy.special.logsumexp(y, axis=-1)
    y = y + prior_scalar
    return -y


# ----------------------------------- main ------------------------------------
if __name__ == "__main__":
    n_mix_comp = 8      # K
    dim = 32            # latent dimension
    N = 16              # number of representations (batch)
    mean_init = (2.0, 5.0)
    sd_init = (0.5, 1.0)
    weight_alpha = 1

    key = jax.random.PRNGKey(0)
    k_mean, k_x = jax.random.split(key)

    # deterministic parameter init matching GaussianMixture.__init__ (diagonal cov)
    mean = softball_sample(k_mean, n_mix_comp, dim, mean_init[0])          # (K, dim)
    log_var = jnp.full((n_mix_comp, dim), 2.0 * math.log(sd_init[0]),
                       dtype=jnp.float32)                                   # (K, dim)
    weight = jnp.ones((n_mix_comp,), dtype=jnp.float32)                     # (K,)

    x = jax.random.normal(k_x, (N, dim), dtype=jnp.float32)

    prior = prior_log_prob(mean, log_var, dim, n_mix_comp, mean_init, sd_init, weight_alpha)

    # TODO(synk): sampling / clustering / representation-selection methods of the
    # module are host-side utilities and are not implemented as kernels.
    out = gmm_forward_pallas(x, mean, log_var, weight, prior)
    out = jax.block_until_ready(out)

    ref = gmm_forward_ref(x, mean, log_var, weight, prior)
    assert out.shape == (N,)
    assert jnp.allclose(out, ref, rtol=2e-4, atol=1e-2), (out, ref)

    print("KERNEL_OK")
</pallas_src>

<mosaic_0001>
module attributes {stable_mosaic.version = 11 : i64} {
  func.func @gmm_nll_kernel(%arg0: i32, %arg1: memref<128x32xf32, #tpu.memory_space<vmem>>, %arg2: memref<64x8xf32, #tpu.memory_space<vmem>>, %arg3: memref<8x1xf32, #tpu.memory_space<vmem>>, %arg4: memref<1x128xf32, #tpu.memory_space<vmem>>) attributes {dimension_semantics = [#tpu.dimension_semantics<parallel>], iteration_bounds = array<i64: 1>, scalar_prefetch = 0 : i64, scratch_operands = 0 : i64, tpu.core_type = #tpu.core_type<tc>, window_params = [{transform_indices = @transform_0, window_bounds = array<i64: 128, 32>}, {pipeline_mode = #tpu.pipeline_mode<synchronous>, transform_indices = @transform_1, window_bounds = array<i64: 64, 8>}, {pipeline_mode = #tpu.pipeline_mode<synchronous>, transform_indices = @transform_2, window_bounds = array<i64: 8, 1>}, {transform_indices = @transform_3, window_bounds = array<i64: 1, 128>}]} {
    %c0 = arith.constant 0 : index
    %c0_0 = arith.constant 0 : index
    %0 = vector.load %arg1[%c0, %c0_0] : memref<128x32xf32, #tpu.memory_space<vmem>>, vector<128x32xf32>
    %1 = arith.mulf %0, %0 : vector<128x32xf32>
    %2 = tpu.concatenate %1, %0 in 1 : vector<128x32xf32>, vector<128x32xf32> -> vector<128x64xf32>
    %c0_1 = arith.constant 0 : index
    %c0_2 = arith.constant 0 : index
    %3 = vector.load %arg2[%c0_1, %c0_2] : memref<64x8xf32, #tpu.memory_space<vmem>>, vector<64x8xf32>
    %cst = arith.constant dense<0.000000e+00> : vector<128x8xf32>
    %4 = tpu.matmul %2, %3, %cst {dimension_numbers = #tpu.dot_dimension_numbers<[1], [0], [0], [1], [0, 0, 1, 1], [], []>} : vector<128x64xf32>, vector<64x8xf32>, vector<128x8xf32> -> vector<128x8xf32>
    %5 = tpu.transpose %4, [1, 0] : vector<128x8xf32> -> vector<8x128xf32>
    %c0_3 = arith.constant 0 : index
    %c0_4 = arith.constant 0 : index
    %6 = vector.load %arg3[%c0_3, %c0_4] : memref<8x1xf32, #tpu.memory_space<vmem>>, vector<8x1xf32>
    %7 = vector.broadcast %6 : vector<8x1xf32> to vector<8x128xf32>
    %8 = arith.addf %5, %7 : vector<8x128xf32>
    %cst_5 = arith.constant dense<0xFF800000> : vector<128xf32>
    %9 = vector.multi_reduction <maximumf>, %8, %cst_5 [0] : vector<8x128xf32> to vector<128xf32>
    %10 = vector.shape_cast %9 : vector<128xf32> to vector<1x128xf32>
    %11 = vector.broadcast %10 : vector<1x128xf32> to vector<8x128xf32>
    %12 = arith.subf %8, %11 : vector<8x128xf32>
    %13 = math.exp %12 : vector<8x128xf32>
    %cst_6 = arith.constant dense<0.000000e+00> : vector<128xf32>
    %14 = vector.multi_reduction <add>, %13, %cst_6 [0] : vector<8x128xf32> to vector<128xf32>
    %15 = vector.shape_cast %14 : vector<128xf32> to vector<1x128xf32>
    %16 = math.log %15 : vector<1x128xf32>
    %17 = arith.addf %10, %16 : vector<1x128xf32>
    %cst_7 = arith.constant 0.000000e+00 : f32
    %18 = vector.broadcast %cst_7 : f32 to vector<1x128xf32>
    %19 = arith.subf %18, %17 : vector<1x128xf32>
    %c0_8 = arith.constant 0 : index
    %c0_9 = arith.constant 0 : index
    %20 = vector.load %arg4[%c0_8, %c0_9] : memref<1x128xf32, #tpu.memory_space<vmem>>, vector<1x128xf32>
    tpu.vector_store %arg4[%c0_8, %c0_9], %19 {strides = array<i32>} : memref<1x128xf32, #tpu.memory_space<vmem>>, vector<1x128xf32>,
    return
  }
  func.func @transform_0(%arg0: i32) -> (i32, i32) {
    %c0_i32 = arith.constant 0 : i32
    %c0_i32_0 = arith.constant 0 : i32
    return %arg0, %c0_i32 : i32, i32
  }
  func.func @transform_1(%arg0: i32) -> (i32, i32) {
    %c0_i32 = arith.constant 0 : i32
    %c0_i32_0 = arith.constant 0 : i32
    %c0_i32_1 = arith.constant 0 : i32
    return %c0_i32, %c0_i32_0 : i32, i32
  }
  func.func @transform_2(%arg0: i32) -> (i32, i32) {
    %c0_i32 = arith.constant 0 : i32
    %c0_i32_0 = arith.constant 0 : i32
    %c0_i32_1 = arith.constant 0 : i32
    return %c0_i32, %c0_i32_0 : i32, i32
  }
  func.func @transform_3(%arg0: i32) -> (i32, i32) {
    %c0_i32 = arith.constant 0 : i32
    %c0_i32_0 = arith.constant 0 : i32
    return %c0_i32, %arg0 : i32, i32
  }
}

</mosaic_0001>

<bundles_post_ra>
// kernel: tpu_custom_call.1
= control target key start
LH: loop header
LB: loop body
LE: loop exit
PB: predicated region body
PF: predicated region fallthrough
CT: control target
= control target key end

     0   :  { %s400_s16 = smov 32   ;;  %s604_s0 = inlined_call_operand.vmem [shape: f32[16,32], index: 0, kind: input, shape index: {}]   ;;  %s605_s1 = inlined_call_operand.vmem [shape: f32[64,8], index: 1, kind: input, shape index: {}]   ;;  %s606_s2 = inlined_call_operand.vmem [shape: f32[8,1], index: 2, kind: input, shape index: {}]   ;;  %s607_s3 = inlined_call_operand.hbm [shape: f32[1,16], index: 3, kind: output, shape index: {}]  }
   0x1   :  { %v426_v0 = vld [vmem:[%s604_s0] sm:$0xff]  ;;  %v135_v3 = vld [vmem:[%s605_s1 + $0x38] sm:$0xff]  ;;  %v134_v4 = vld [vmem:[%s605_s1 + $0x30] sm:$0xff] }
   0x2   :  { %v431_v1 = vld [vmem:[%s604_s0 + $0x20] sm:$0xff]  ;;  %63 = vrot.lane.b32.xlu0 %v426_v0, %s400_s16  ;;  %v453_v5 = vld [vmem:[%s604_s0 + $0x8] sm:$0xff]  ;;  %v458_v6 = vld [vmem:[%s604_s0 + $0x10] sm:$0xff]  ;;  %193 = vmatpush.msra.mxu0 %v135_v3 }
   0x3   :  { %71 = vrot.lane.b32.xlu1 %v431_v1, %s400_s16  ;;  %v440_v2 = vld [vmem:[%s604_s0 + $0x40] sm:$0xff]  ;;  %341 = vmatpush.msra.mxu1 %v135_v3  ;;  %v133_v7 = vld [vmem:[%s605_s1 + $0x28] sm:$0xff] }
   0x4   :  { %79 = vrot.lane.b32.xlu2 %v440_v2, %s400_s16  ;;  %342 = vmatpush.msra.mxu2 %v135_v3 }
   0x5   :  { %343 = vmatpush.msra.mxu3 %v135_v3 }
   0x6   :  { %8 = vsyncpa [#allocation3], 0  ;;  %v466_v8 = vld [vmem:[%s604_s0 + $0x28] sm:$0xff]  ;;  %194 = vmatpush.msra.mxu0 %v134_v4  ;;  %344 = vmatpush.msra.mxu1 %v134_v4  ;;  %v132_v9 = vld [vmem:[%s605_s1 + $0x20] sm:$0xff]  ;;  %v39_v24 = vmul.f32 %v440_v2, %v440_v2  ;;  %vm111_vm0 = vcmask 261120   ;;  %vm136_vm1 = vcmask 523264   ;;  %v31_v27 = vmul.f32 %v426_v0, %v426_v0 }
   0x7   :  { %v131_v10 = vld [vmem:[%s605_s1 + $0x18] sm:$0xff]  ;;  %345 = vmatpush.msra.mxu2 %v134_v4  ;;  %v130_v11 = vld [vmem:[%s605_s1 + $0x10] sm:$0xff]  ;;  %346 = vmatpush.msra.mxu3 %v134_v4  ;;  %v491_v13 = vld [vmem:[%s604_s0 + $0x48] sm:$0xff]  ;;  %v35_v28 = vmul.f32 %v431_v1, %v431_v1  ;;  %v36_v34 = vmul.f32 %v466_v8, %v466_v8  ;;  %v32_v35 = vmul.f32 %v453_v5, %v453_v5  ;;  %s316_s10 = sshll.u32 %s607_s3, 4  ;;  %s317_s10 = int_to_ptr.hbm [resolvable:$true] %s316_s10 }
   0x8   :  { %195 = vmatpush.msra.mxu0 %v133_v7  ;;  %347 = vmatpush.msra.mxu1 %v133_v7  ;;  %v486_v12 = vld [vmem:[%s604_s0 + $0x18] sm:$0xff]  ;;  %v129_v14 = vld [vmem:[%s605_s1 + $0x8] sm:$0xff]  ;;  %v21_v15 = vld [vmem:[%s604_s0 + $0x30] sm:$0xff]  ;;  %v33_v41 = vmul.f32 %v458_v6, %v458_v6  ;;  %v40_v43 = vmul.f32 %v491_v13, %v491_v13 }
   0x9   :  { %348 = vmatpush.msra.mxu2 %v133_v7  ;;  %349 = vmatpush.msra.mxu3 %v133_v7  ;;  %v25_v16 = vld [vmem:[%s604_s0 + $0x50] sm:$0xff]  ;;  %v27_v17 = vld [vmem:[%s604_s0 + $0x60] sm:$0xff]  ;;  %v22_v18 = vld [vmem:[%s604_s0 + $0x38] sm:$0xff]  ;;  %v37_v42 = vmul.f32 %v21_v15, %v21_v15  ;;  %v34_v49 = vmul.f32 %v486_v12, %v486_v12 }
   0xa   :  { %65 = vrot.lane.b32.xlu0 %v453_v5, %s400_s16  ;;  %196 = vmatpush.msra.mxu0 %v132_v9  ;;  %v519_v19 = vld [vmem:[%s604_s0 + $0x58] sm:$0xff]  ;;  %v524_v20 = vld [vmem:[%s604_s0 + $0x68] sm:$0xff]  ;;  %v128_v22 = vld [vmem:[%s605_s1] sm:$0xff]  ;;  %v38_v50 = vmul.f32 %v22_v18, %v22_v18  ;;  %v41_v52 = vmul.f32 %v25_v16, %v25_v16  ;;  %v43_v53 = vmul.f32 %v27_v17, %v27_v17 }
   0xb   :  { %67 = vrot.lane.b32.xlu1 %v458_v6, %s400_s16  ;;  %350 = vmatpush.msra.mxu1 %v132_v9  ;;  %v533_v21 = vld [vmem:[%s604_s0 + $0x78] sm:$0xff]  ;;  %v29_v23 = vld [vmem:[%s604_s0 + $0x70] sm:$0xff]  ;;  %v42_v60 = vmul.f32 %v519_v19, %v519_v19  ;;  %v44_v61 = vmul.f32 %v524_v20, %v524_v20 }
   0xc   :  { %73 = vrot.lane.b32.xlu2 %v466_v8, %s400_s16  ;;  %197 = vmatpush.msra.mxu0 %v131_v10  ;;  %v45_v2 = vmul.f32 %v29_v23, %v29_v23  ;;  %v46_v5 = vmul.f32 %v533_v21, %v533_v21 }
   0xd   :  { %353 = vmatpush.msra.mxu1 %v131_v10  ;;  %351 = vmatpush.msra.mxu2 %v132_v9 }
   0xe   :  { %198 = vmatpush.msra.mxu0 %v130_v11  ;;  %352 = vmatpush.msra.mxu3 %v132_v9 }
   0xf   :  { %356 = vmatpush.msra.mxu1 %v130_v11  ;;  %354 = vmatpush.msra.mxu2 %v131_v10 }
  0x10   :  { %199 = vmatpush.msra.mxu0 %v129_v14  ;;  %355 = vmatpush.msra.mxu3 %v131_v10 }
  0x11   :  { %359 = vmatpush.msra.mxu1 %v129_v14  ;;  %357 = vmatpush.msra.mxu2 %v130_v11 }
  0x12   :  { %69 = vrot.lane.b32.xlu0 %v486_v12, %s400_s16  ;;  %358 = vmatpush.msra.mxu3 %v130_v11 }
  0x13   :  { %81 = vrot.lane.b32.xlu1 %v491_v13, %s400_s16  ;;  %360 = vmatpush.msra.mxu2 %v129_v14 }
  0x14   :  { %75 = vrot.lane.b32.xlu2 %v21_v15, %s400_s16  ;;  %361 = vmatpush.msra.mxu3 %v129_v14  ;;  %v282_v14 = vld [vmem:[%s606_s2] sm:$0xff]  ;;  %v401_v15 = vmov 0   ;;  %s402_s2 = smov [#allocation2]  }
  0x15   :  { %200 = vmatpush.msra.mxu0 %v128_v22  ;;  %362 = vmatpush.msra.mxu1 %v128_v22 }
  0x16   :  { %363 = vmatpush.msra.mxu2 %v128_v22  ;;  %364 = vmatpush.msra.mxu3 %v128_v22 }
  0x17   :  { %368 = vset.pattern.permute.xlu2 %v401_v15  ;;  %369 = vset.pattern.permute.xlu0 %v401_v15 }
  0x1a   :  { %87 = vrot.lane.b32.xlu0 %v27_v17, %s400_s16 }
  0x1b   :  { %83 = vrot.lane.b32.xlu1 %v25_v16, %s400_s16 }
  0x1c   :  { %77 = vrot.lane.b32.xlu2 %v22_v18, %s400_s16 }
  0x22   :  { %89 = vrot.lane.b32.xlu0 %v524_v20, %s400_s16 }
  0x23   :  { %85 = vrot.lane.b32.xlu1 %v519_v19, %s400_s16 }
  0x24   :  { %91 = vrot.lane.b32.xlu2 %v29_v23, %s400_s16 }
  0x2a   :  { %93 = vrot.lane.b32.xlu0 %v533_v21, %s400_s16  ;;  %s314_s16 = sshll.u32 %s402_s2, 4  ;;  %s315_s16 = int_to_ptr.vmem [resolvable:$true] %s314_s16 }
  0x2c   :  { %285 = vperm.xlu2 %368, %v282_v14  }
  0x5e   :  { %v80_v25 = vpop.permute.xlu2 %79 }
  0x5f   :  { %v120_v26 = vsel %vm111_vm0, %v39_v24, %v80_v25 }
  0x60   :  { %333 = vmatmul.msk.f32.vlgmr.msra.gmra.mxu2 %vm136_vm1, %v120_v26 }
  0x66   :  { %v74_v33 = vpop.permute.xlu2 %73 }
  0x67   :  { %v117_v36 = vsel %vm111_vm0, %v36_v34, %v74_v33 }
  0x6e   :  { %v76_v40 = vpop.permute.xlu2 %75 }
  0x6f   :  { %v118_v45 = vsel %vm111_vm0, %v37_v42, %v76_v40 }
  0x74   :  { %v64_v29 = vpop.permute.xlu0 %63 }
  0x75   :  { %v72_v30 = vpop.permute.xlu1 %71  ;;  %v112_v31 = vsel %vm111_vm0, %v31_v27, %v64_v29 }
  0x76   :  { %v116_v32 = vsel %vm111_vm0, %v35_v28, %v72_v30  ;;  %325 = vmatmul.msk.f32.vlgmr.msra.gmra.mxu0 %vm136_vm1, %v112_v31  ;;  %v78_v51 = vpop.permute.xlu2 %77 }
  0x77   :  { %329 = vmatmul.msk.f32.vlgmr.msra.gmra.mxu1 %vm136_vm1, %v116_v32  ;;  %v119_v55 = vsel %vm111_vm0, %v38_v50, %v78_v51 }
  0x7c   :  { %v66_v37 = vpop.permute.xlu0 %65 }
  0x7d   :  { %v68_v38 = vpop.permute.xlu1 %67  ;;  %v113_v39 = vsel %vm111_vm0, %v32_v35, %v66_v37 }
  0x7e   :  { %326 = vmatmul.msk.f32.gmra.mxu0 %vm136_vm1, %v113_v39  ;;  %v114_v44 = vsel %vm111_vm0, %v33_v41, %v68_v38  ;;  %v92_v3 = vpop.permute.xlu2 %91 }
  0x7f   :  { %330 = vmatmul.msk.f32.gmra.mxu1 %vm136_vm1, %v117_v36  ;;  %v126_v4 = vsel %vm111_vm0, %v45_v2, %v92_v3 }
  0x84   :  { %v70_v46 = vpop.permute.xlu0 %69 }
  0x85   :  { %v82_v47 = vpop.permute.xlu1 %81  ;;  %v115_v54 = vsel %vm111_vm0, %v34_v49, %v70_v46 }
  0x86   :  { %v121_v48 = vsel %vm111_vm0, %v40_v43, %v82_v47  ;;  %327 = vmatmul.msk.f32.gmra.mxu0 %vm136_vm1, %v114_v44  ;;  %v286_v26 = vpop.permute.xlu2 %285 }
  0x87   :  { %331 = vmatmul.msk.f32.gmra.mxu1 %vm136_vm1, %v118_v45  ;;  %334 = vmatmul.msk.f32.gmra.mxu2 %vm136_vm1, %v121_v48 }
  0x8c   :  { %v88_v57 = vpop.permute.xlu0 %87 }
  0x8d   :  { %v84_v56 = vpop.permute.xlu1 %83  ;;  %v124_v59 = vsel %vm111_vm0, %v43_v53, %v88_v57 }
  0x8e   :  { %v122_v58 = vsel %vm111_vm0, %v41_v52, %v84_v56  ;;  %328 = vmatmul.msk.f32.gmra.mxu0 %vm136_vm1, %v115_v54  ;;  %337 = vmatmul.msk.f32.vlgmr.msra.gmra.mxu3 %vm136_vm1, %v124_v59 }
  0x8f   :  { %332 = vmatmul.msk.f32.gmra.mxu1 %vm136_vm1, %v119_v55  ;;  %335 = vmatmul.msk.f32.gmra.mxu2 %vm136_vm1, %v122_v58 }
  0x94   :  { %v90_v63 = vpop.permute.xlu0 %89 }
  0x95   :  { %v86_v62 = vpop.permute.xlu1 %85  ;;  %v125_v1 = vsel %vm111_vm0, %v44_v61, %v90_v63 }
  0x96   :  { %v123_v0 = vsel %vm111_vm0, %v42_v60, %v86_v62  ;;  %338 = vmatmul.msk.f32.gmra.mxu3 %vm136_vm1, %v125_v1 }
  0x97   :  { %336 = vmatmul.msk.f32.gmra.mxu2 %vm136_vm1, %v123_v0 }
  0x9c   :  { %v94_v6 = vpop.permute.xlu0 %93 }
  0x9d   :  { %v127_v7 = vsel %vm111_vm0, %v46_v5, %v94_v6 }
  0x9e   :  { %339 = vmatmul.msk.f32.gmra.mxu3 %vm136_vm1, %v126_v4 }
  0xa6   :  { %340 = vmatmul.msk.f32.gmra.mxu3 %vm136_vm1, %v127_v7 }
  0xe3   :  { %v226_v18 = vpop.f32.mrf.mxu2 }
  0xf3   :  { %v202_v8 = vpop.f32.mrf.mxu0 }
  0xf4   :  { %250 = vxpose.xlu1.b32.start [1/16] (narrow) %v202_v8, 8  ;;  %v214_v12 = vpop.f32.mrf.mxu1 }
  0xfb   :  { %v205_v9 = vpop.f32.mrf.mxu0 }
  0xfc   :  { %251 = vxpose.xlu1.b32.cont [2/16] (narrow) %v205_v9, 8  ;;  %v217_v13 = vpop.f32.mrf.mxu1 }
 0x103   :  { %v208_v10 = vpop.f32.mrf.mxu0 }
 0x104   :  { %252 = vxpose.xlu1.b32.cont [3/16] (narrow) %v208_v10, 8  ;;  %v220_v16 = vpop.f32.mrf.mxu1 }
 0x10a   :  { %v229_v19 = vpop.f32.mrf.mxu2 }
 0x10b   :  { %v211_v11 = vpop.f32.mrf.mxu0 }
 0x10c   :  { %253 = vxpose.xlu1.b32.cont [4/16] (narrow) %v211_v11, 8  ;;  %v223_v17 = vpop.f32.mrf.mxu1 }
 0x111   :  { %v238_v22 = vpop.f32.mrf.mxu3 }
 0x112   :  { %v232_v20 = vpop.f32.mrf.mxu2 }
 0x114   :  { %254 = vxpose.xlu1.b32.cont [5/16] (narrow) %v214_v12, 8 }
 0x119   :  { %v241_v23 = vpop.f32.mrf.mxu3 }
 0x11a   :  { %v235_v21 = vpop.f32.mrf.mxu2 }
 0x11c   :  { %255 = vxpose.xlu1.b32.cont [6/16] (narrow) %v217_v13, 8 }
 0x121   :  { %v244_v24 = vpop.f32.mrf.mxu3 }
 0x124   :  { %256 = vxpose.xlu1.b32.cont [7/16] (narrow) %v220_v16, 8 }
 0x129   :  { %v247_v25 = vpop.f32.mrf.mxu3 }
 0x12c   :  { %257 = vxpose.xlu1.b32.cont [8/16] (narrow) %v223_v17, 8 }
 0x134   :  { %258 = vxpose.xlu1.b32.cont [9/16] (narrow) %v226_v18, 8 }
 0x13c   :  { %259 = vxpose.xlu1.b32.cont [10/16] (narrow) %v229_v19, 8 }
 0x144   :  { %260 = vxpose.xlu1.b32.cont [11/16] (narrow) %v232_v20, 8 }
 0x14c   :  { %261 = vxpose.xlu1.b32.cont [12/16] (narrow) %v235_v21, 8 }
 0x154   :  { %262 = vxpose.xlu1.b32.cont [13/16] (narrow) %v238_v22, 8 }
 0x15c   :  { %263 = vxpose.xlu1.b32.cont [14/16] (narrow) %v241_v23, 8 }
 0x164   :  { %264 = vxpose.xlu1.b32.cont [15/16] (narrow) %v244_v24, 8 }
 0x16c   :  { %265 = vxpose.xlu1.b32.end [16/16] (narrow) %v247_v25, 8 }
 0x198   :  { %v266_v27 = vpop.trf.xlu1 }
 0x199   :  { %v288_v28 = vadd.f32 %v286_v26, %v266_v27 }
 0x19b   :  { %v289_v29 = vrot.slane %v288_v28, 4 }
 0x19d   :  { %v290_v30 = vmax.f32 %v288_v28, %v289_v29 }
 0x19f   :  { %v291_v31 = vrot.slane %v290_v30, 2 }
 0x1a1   :  { %v292_v32 = vmax.f32 %v290_v30, %v291_v31 }
 0x1a3   :  { %v293_v33 = vrot.slane %v292_v32, 1 }
 0x1a5   :  { %v294_v34 = vmax.f32 %v292_v32, %v293_v33 }
 0x1a7   :  { %v295_v35 = vsub.f32 %v288_v28, %v294_v34 }
 0x1a9   :  { %v296_v36 = vmul.f32 1.442695, %v295_v35 }
 0x1ab   :  { %370 = vpow2.f32 %v296_v36 }
 0x1b1   :  { %v371_v37 = vpop.eup %370 }
 0x1b2   :  { %v298_v38 = vrot.slane %v371_v37, 4 }
 0x1b4   :  { %v299_v39 = vadd.f32 %v371_v37, %v298_v38 }
 0x1b6   :  { %v300_v40 = vrot.slane %v299_v39, 2 }
 0x1b8   :  { %v301_v41 = vadd.f32 %v300_v40, %v299_v39 }
 0x1ba   :  { %v302_v42 = vrot.slane %v301_v41, 1 }
 0x1bc   :  { %v303_v43 = vadd.f32 %v302_v42, %v301_v41 }
 0x1be   :  { %372 = vlog2.f32 %v303_v43 }
 0x1c4   :  { %v373_v44 = vpop.eup %372 }
 0x1c5   :  { %v305_v45 = vmul.f32 0.6931472, %v373_v44 }
 0x1c7   :  { %v306_v46 = vadd.f32 %v305_v45, %v294_v34 }
 0x1c9   :  { %v307_v47 = vsub.f32 0.0, %v306_v46 }
 0x1cb   :  { %308 = vst [vmem:[#allocation2] sm:$0x1] %v307_v47 }
 0x1cc   :  { %319 = dma.vmem_to_hbm [thread:$0]  %s315_s16, 16, %s317_s10, [#allocation3]  }
 0x1cd   :  { %398 = dma.done.wait [#allocation3], 16  }
 0x1ce   :  { %399 = vsyncadd [#allocation3], 4294967280 }
 0x1cf   :  { %324 = vsyncpa [#allocation3], 1 }

</bundles_post_ra>
